<compile_context>
chip_gen: v7x
topology: tpu7x:2x2x1
jax: 0.10.0
libtpu: 0.0.40
codegen_flags: <defaults>
</compile_context>

<pallas_src>
import jax
import jax.numpy as jnp
from jax import lax
from jax.experimental import pallas as pl
from jax.experimental.pallas import tpu as pltpu

NEG_SLOPE = 0.01     # nn.LeakyReLU default
BN_EPS = 1e-5        # nn.BatchNorm1d default
LANES = 128
GAMMA_LANE = 16      # gamma column lane inside each block's slab region
C0_LANE = 17         # precombined bias (W @ beta + b) column lane

# bf16 operands for the middle (10x10)x(10xB) MXU matmuls (v6e/v7x are
# bf16-native; f32 is multi-pass).  Off by default: exactness for the demo,
# and at small batch the matmul is not the bottleneck.
MATMUL_IN_BF16 = False

# (in_features, out_features) of the 7 (BN -> Linear -> LeakyReLU) blocks.
DIMS = [(1, 10), (10, 10), (10, 10), (10, 10), (10, 10), (10, 5), (5, 1)]

# dot_general dims: contract lhs axis 0 with rhs axis 0  (i.e. lhs^T @ rhs)
_DN = (((0,), (0,)), ((), ()))


def _up8(n):
    return (n + 7) & ~7


def _slab_layout():
    """Row offset of each block's packed region inside the (rows, 128) slab.

    Per block, a single 8-row-aligned region of _up8(max(fin, fout)) rows:
      W^T   : rows [r, r+fin),  lanes [0, fout)      (fin > 1 and fout > 1)
      W col : rows [r, r+fout), lane 0               (fin == 1; column = torch W[:,0])
              rows [r, r+fin),  lane 0               (fout == 1; column = torch W[0,:])
      gamma : rows [r, r+fin),  lane GAMMA_LANE
      c0    : rows [r, r+fout), lane C0_LANE         (c0 = W @ beta + b, host-baked)
    """
    layout = []
    r = 0
    for fin, fout in DIMS:
        layout.append({"row": r})
        r += _up8(max(fin, fout))
    return r, layout


def pack_params(params):
    """params: 7 tuples (gamma (fin,), beta (fin,), W (fout,fin) torch layout, b (fout,))."""
    total, layout = _slab_layout()
    slab = jnp.zeros((total, LANES), jnp.float32)
    for (gamma, beta, w, b), ent, (fin, fout) in zip(params, layout, DIMS):
        r = ent["row"]
        c0 = w @ beta + b                                    # (fout,), batch-independent bias
        if fin == 1:
            slab = slab.at[r:r + fout, 0].set(w[:, 0])
        elif fout == 1:
            slab = slab.at[r:r + fin, 0].set(w[0, :])
        else:
            slab = slab.at[r:r + fin, 0:fout].set(w.T)
        slab = slab.at[r:r + fin, GAMMA_LANE].set(gamma)
        slab = slab.at[r:r + fout, C0_LANE].set(c0)
    return slab


# ---------------------------------------------------------------------------
# Kernel
# ---------------------------------------------------------------------------
def _make_kernel(b_real, b_pad, layout):
    need_mask = b_real != b_pad
    inv_b = 1.0 / float(b_real)
    n_blocks = len(DIMS)

    def kernel(x_ref, p_ref, o_ref):
        # x: [features, batch_padded]; padded columns are exactly 0 on entry and
        # are re-zeroed after every block (except the last) so BN stats stay exact.
        x = x_ref[...]
        if need_mask:
            lane = lax.broadcasted_iota(jnp.int32, (1, b_pad), 1)
            mask = (lane < b_real).astype(jnp.float32)

        for blk, ((fin, fout), ent) in enumerate(zip(DIMS, layout)):
            r = ent["row"]
            g = p_ref[r:r + fin, GAMMA_LANE:GAMMA_LANE + 1]    # (fin, 1)
            c0 = p_ref[r:r + fout, C0_LANE:C0_LANE + 1]        # (fout, 1)

            # Training-mode BN stats over the real batch, fully centered.
            mu = jnp.sum(x, axis=1, keepdims=True) * inv_b     # (fin, 1)
            xc = x - mu                                        # (fin, B)
            if need_mask:
                xc = xc * mask                                 # padded cols -> 0
            var = jnp.sum(xc * xc, axis=1, keepdims=True) * inv_b   # biased var
            s = g * lax.rsqrt(var + BN_EPS)                    # (fin, 1)

            # y = (W * s) @ (x - mu) + (W @ beta + b)   == W @ BN(x) + b
            if fin == 1:
                # K=1 "matmul" -> VPU broadcast outer product
                w = p_ref[r:r + fout, 0:1]                     # (fout, 1)
                y = w * (s * xc) + c0                          # (fout, B)
            elif fout == 1:
                # N=1 "matmul" -> VPU multiply + sublane reduce
                w = p_ref[r:r + fin, 0:1]                      # (fin, 1)
                y = jnp.sum((w * s) * xc, axis=0, keepdims=True) + c0   # (1, B)
            else:
                # single MXU matmul per block (bias already folded into c0)
                w_t = p_ref[r:r + fin, 0:fout]                 # (fin, fout) = W^T
                lhs = w_t * s                                  # folded weights
                rhs = xc
                if MATMUL_IN_BF16:
                    lhs = lhs.astype(jnp.bfloat16)
                    rhs = rhs.astype(jnp.bfloat16)
                y = lax.dot_general(lhs, rhs, _DN,
                                    preferred_element_type=jnp.float32) + c0   # (fout, B)

            x = jnp.maximum(y, NEG_SLOPE * y)                  # LeakyReLU(0.01)
            if need_mask and blk != n_blocks - 1:
                x = x * mask                                   # keep padded cols at 0

        o_ref[...] = x                                         # (1, b_pad) lane-dense store

    return kernel


def net_forward(x, slab):
    """x: (batch, 1) input; slab: packed parameter slab from pack_params."""
    b_real = x.shape[0]
    b_pad = max(LANES, ((b_real + LANES - 1) // LANES) * LANES)
    slab_rows, layout = _slab_layout()
    slab_bytes = slab_rows * LANES * 4

    # Working-set estimate (batch-resident design): a few (<=16, b_pad) f32
    # activation/temp tiles + mask + in/out + slab.
    work_bytes = slab_bytes + 200 * b_pad + (1 << 20)
    # v7x has 64 MiB VMEM per TensorCore; beyond this the layer-staged fallback
    # described in the header is required.
    assert work_bytes <= 56 * (1 << 20), (
        "batch too large for the VMEM-resident path (v7x 64 MiB); "
        "use a layer-staged, gridded variant for this size")
    vmem_limit = min(64 << 20, max(32 << 20, work_bytes))

    # host-side: x.float(), transpose to [features, batch], zero-pad batch to 128
    xt = jnp.zeros((1, b_pad), jnp.float32).at[0, :b_real].set(
        x.astype(jnp.float32)[:, 0])

    flops = 2 * sum(fi * fo for fi, fo in DIMS) * b_real
    transcendentals = sum(fi for fi, _ in DIMS)               # one rsqrt per feature
    bytes_accessed = slab_bytes + 2 * 4 * b_pad

    vmem = pl.BlockSpec(memory_space=pltpu.MemorySpace.VMEM)
    out = pl.pallas_call(
        _make_kernel(b_real, b_pad, layout),
        out_shape=jax.ShapeDtypeStruct((1, b_pad), jnp.float32),
        in_specs=[vmem, vmem],
        out_specs=vmem,
        compiler_params=pltpu.CompilerParams(vmem_limit_bytes=vmem_limit),
        cost_estimate=pl.CostEstimate(flops=flops,
                                      transcendentals=transcendentals,
                                      bytes_accessed=bytes_accessed),
    )(xt, slab)
    return out[:, :b_real].T     # back to (batch, 1)


# ---------------------------------------------------------------------------
# Deterministic parameter init (mirrors the PyTorch __init__, torch layout,
# including its quirks: bn3 bias left at default 0, fc3 weight re-initialised
# to mean 5, fc5 weight and fc6 left at default Linear init).
# ---------------------------------------------------------------------------
def init_params(key):
    # (fin, fout, bn_gamma_mean, bn_beta, w_init, b_init)
    cfg = [
        (1, 10, 10.0, 3.0, ("normal", 10.0), ("const", 3.0)),   # bnin / input
        (10, 10, 10.0, 3.0, ("normal", 10.0), ("const", 3.0)),  # bn1 / fc1
        (10, 10, 10.0, 3.0, ("normal", 10.0), ("const", 3.0)),  # bn2 / fc2
        (10, 10, 10.0, 0.0, ("normal", 5.0), ("const", 3.0)),   # bn3 (default bias) / fc3 (re-init mean=5)
        (10, 10, 10.0, 3.0, ("normal", 10.0), ("const", 3.0)),  # bn4 / fc4
        (10, 5, 5.0, 3.0, ("default",), ("const", 3.0)),        # bn5 / fc5 (default weight)
        (5, 1, 5.0, 3.0, ("default",), ("default",)),           # bn6 / fc6 (fully default)
    ]
    params = []
    for (fin, fout, g_mean, beta_val, w_init, b_init) in cfg:
        key, k_g, k_w, k_b = jax.random.split(key, 4)
        gamma = (g_mean + 0.1 * jax.random.normal(k_g, (fin,))).astype(jnp.float32)
        beta = jnp.full((fin,), beta_val, dtype=jnp.float32)
        bound = float(fin) ** -0.5      # torch default Linear init bound
        if w_init[0] == "normal":
            w = (w_init[1] + 0.1 * jax.random.normal(k_w, (fout, fin))).astype(jnp.float32)
        else:
            w = jax.random.uniform(k_w, (fout, fin), jnp.float32, -bound, bound)
        if b_init[0] == "const":
            b = jnp.full((fout,), b_init[1], dtype=jnp.float32)
        else:
            b = jax.random.uniform(k_b, (fout,), jnp.float32, -bound, bound)
        params.append((gamma, beta, w, b))
    return params


# ---------------------------------------------------------------------------
# Pure-JAX reference (PyTorch-layout math) for a sanity check
# ---------------------------------------------------------------------------
def net_ref(x, params):
    x = x.astype(jnp.float32)
    for (gamma, beta, w, b) in params:
        mu = jnp.mean(x, axis=0, keepdims=True)
        var = jnp.mean((x - mu) ** 2, axis=0, keepdims=True)
        x = (x - mu) * lax.rsqrt(var + BN_EPS) * gamma + beta
        x = x @ w.T + b
        x = jnp.where(x >= 0, x, NEG_SLOPE * x)
    return x


if __name__ == "__main__":
    key = jax.random.PRNGKey(0)
    k_params, k_x = jax.random.split(key)

    params = init_params(k_params)
    slab = pack_params(params)

    # Net takes scalar-feature inputs: shape [batch, 1]
    x = jax.random.normal(k_x, (8, 1), dtype=jnp.float32)

    out = net_forward(x, slab)
    out = jax.block_until_ready(out)

    ref = net_ref(x, params)
    assert out.shape == (8, 1), out.shape
    assert jnp.allclose(out, ref, rtol=1e-3, atol=1e-3), (out, ref)

    print("KERNEL_OK")
</pallas_src>

<mosaic_0001>
module attributes {stable_mosaic.version = 11 : i64} {
  func.func @kernel(%arg0: memref<1x128xf32, #tpu.memory_space<vmem>>, %arg1: memref<104x128xf32, #tpu.memory_space<vmem>>, %arg2: memref<1x128xf32, #tpu.memory_space<vmem>>) attributes {dimension_semantics = [], scalar_prefetch = 0 : i64, scratch_operands = 0 : i64, tpu.core_type = #tpu.core_type<tc>} {
    %c0 = arith.constant 0 : index
    %c0_0 = arith.constant 0 : index
    %0 = vector.load %arg0[%c0, %c0_0] : memref<1x128xf32, #tpu.memory_space<vmem>>, vector<1x128xf32>
    %1 = tpu.iota {dimensions = array<i32: 1>} : vector<1x128xi32>
    %c8_i32 = arith.constant 8 : i32
    %2 = vector.broadcast %c8_i32 : i32 to vector<1x128xi32>
    %3 = arith.cmpi slt, %1, %2 : vector<1x128xi32>
    %4 = arith.extui %3 : vector<1x128xi1> to vector<1x128xi32>
    %5 = arith.sitofp %4 : vector<1x128xi32> to vector<1x128xf32>
    %c0_1 = arith.constant 0 : index
    %c16 = arith.constant 16 : index
    %6 = vector.load %arg1[%c0_1, %c16] : memref<104x128xf32, #tpu.memory_space<vmem>>, vector<1x1xf32>
    %c0_2 = arith.constant 0 : index
    %c17 = arith.constant 17 : index
    %7 = vector.load %arg1[%c0_2, %c17] : memref<104x128xf32, #tpu.memory_space<vmem>>, vector<10x1xf32>
    %cst = arith.constant dense<0.000000e+00> : vector<1xf32>
    %8 = vector.multi_reduction <add>, %0, %cst [1] : vector<1x128xf32> to vector<1xf32>
    %9 = vector.shape_cast %8 : vector<1xf32> to vector<1x1xf32>
    %cst_3 = arith.constant 1.250000e-01 : f32
    %10 = vector.broadcast %cst_3 : f32 to vector<1x1xf32>
    %11 = arith.mulf %9, %10 : vector<1x1xf32>
    %12 = vector.broadcast %11 : vector<1x1xf32> to vector<1x128xf32>
    %13 = arith.subf %0, %12 : vector<1x128xf32>
    %14 = arith.mulf %13, %5 : vector<1x128xf32>
    %15 = arith.mulf %14, %14 : vector<1x128xf32>
    %cst_4 = arith.constant dense<0.000000e+00> : vector<1xf32>
    %16 = vector.multi_reduction <add>, %15, %cst_4 [1] : vector<1x128xf32> to vector<1xf32>
    %17 = vector.shape_cast %16 : vector<1xf32> to vector<1x1xf32>
    %cst_5 = arith.constant 1.250000e-01 : f32
    %18 = vector.broadcast %cst_5 : f32 to vector<1x1xf32>
    %19 = arith.mulf %17, %18 : vector<1x1xf32>
    %cst_6 = arith.constant 9.99999974E-6 : f32
    %20 = vector.broadcast %cst_6 : f32 to vector<1x1xf32>
    %21 = arith.addf %19, %20 : vector<1x1xf32>
    %22 = math.rsqrt %21 : vector<1x1xf32>
    %23 = arith.mulf %6, %22 : vector<1x1xf32>
    %c0_7 = arith.constant 0 : index
    %c0_8 = arith.constant 0 : index
    %24 = vector.load %arg1[%c0_7, %c0_8] : memref<104x128xf32, #tpu.memory_space<vmem>>, vector<10x1xf32>
    %25 = vector.broadcast %23 : vector<1x1xf32> to vector<1x128xf32>
    %26 = arith.mulf %25, %14 : vector<1x128xf32>
    %27 = vector.broadcast %24 : vector<10x1xf32> to vector<10x128xf32>
    %28 = vector.broadcast %26 : vector<1x128xf32> to vector<10x128xf32>
    %29 = arith.mulf %27, %28 : vector<10x128xf32>
    %30 = vector.broadcast %7 : vector<10x1xf32> to vector<10x128xf32>
    %31 = arith.addf %29, %30 : vector<10x128xf32>
    %cst_9 = arith.constant 0.00999999977 : f32
    %32 = vector.broadcast %cst_9 : f32 to vector<10x128xf32>
    %33 = arith.mulf %32, %31 : vector<10x128xf32>
    %34 = arith.maximumf %31, %33 : vector<10x128xf32>
    %35 = vector.broadcast %5 : vector<1x128xf32> to vector<10x128xf32>
    %36 = arith.mulf %34, %35 : vector<10x128xf32>
    %c16_10 = arith.constant 16 : index
    %c16_11 = arith.constant 16 : index
    %37 = vector.load %arg1[%c16_10, %c16_11] : memref<104x128xf32, #tpu.memory_space<vmem>>, vector<10x1xf32>
    %c16_12 = arith.constant 16 : index
    %c17_13 = arith.constant 17 : index
    %38 = vector.load %arg1[%c16_12, %c17_13] : memref<104x128xf32, #tpu.memory_space<vmem>>, vector<10x1xf32>
    %cst_14 = arith.constant dense<0.000000e+00> : vector<10xf32>
    %39 = vector.multi_reduction <add>, %36, %cst_14 [1] : vector<10x128xf32> to vector<10xf32>
    %40 = vector.shape_cast %39 : vector<10xf32> to vector<10x1xf32>
    %cst_15 = arith.constant 1.250000e-01 : f32
    %41 = vector.broadcast %cst_15 : f32 to vector<10x1xf32>
    %42 = arith.mulf %40, %41 : vector<10x1xf32>
    %43 = vector.broadcast %42 : vector<10x1xf32> to vector<10x128xf32>
    %44 = arith.subf %36, %43 : vector<10x128xf32>
    %45 = vector.broadcast %5 : vector<1x128xf32> to vector<10x128xf32>
    %46 = arith.mulf %44, %45 : vector<10x128xf32>
    %47 = arith.mulf %46, %46 : vector<10x128xf32>
    %cst_16 = arith.constant dense<0.000000e+00> : vector<10xf32>
    %48 = vector.multi_reduction <add>, %47, %cst_16 [1] : vector<10x128xf32> to vector<10xf32>
    %49 = vector.shape_cast %48 : vector<10xf32> to vector<10x1xf32>
    %cst_17 = arith.constant 1.250000e-01 : f32
    %50 = vector.broadcast %cst_17 : f32 to vector<10x1xf32>
    %51 = arith.mulf %49, %50 : vector<10x1xf32>
    %cst_18 = arith.constant 9.99999974E-6 : f32
    %52 = vector.broadcast %cst_18 : f32 to vector<10x1xf32>
    %53 = arith.addf %51, %52 : vector<10x1xf32>
    %54 = math.rsqrt %53 : vector<10x1xf32>
    %55 = arith.mulf %37, %54 : vector<10x1xf32>
    %c16_19 = arith.constant 16 : index
    %c0_20 = arith.constant 0 : index
    %56 = vector.load %arg1[%c16_19, %c0_20] : memref<104x128xf32, #tpu.memory_space<vmem>>, vector<10x10xf32>
    %57 = vector.broadcast %55 : vector<10x1xf32> to vector<10x10xf32>
    %58 = arith.mulf %56, %57 : vector<10x10xf32>
    %cst_21 = arith.constant dense<0.000000e+00> : vector<10x128xf32>
    %59 = tpu.matmul %58, %46, %cst_21 {dimension_numbers = #tpu.dot_dimension_numbers<[0], [0], [1], [1], [0, 1, 1, 1], [], []>} : vector<10x10xf32>, vector<10x128xf32>, vector<10x128xf32> -> vector<10x128xf32>
    %60 = vector.broadcast %38 : vector<10x1xf32> to vector<10x128xf32>
    %61 = arith.addf %59, %60 : vector<10x128xf32>
    %cst_22 = arith.constant 0.00999999977 : f32
    %62 = vector.broadcast %cst_22 : f32 to vector<10x128xf32>
    %63 = arith.mulf %62, %61 : vector<10x128xf32>
    %64 = arith.maximumf %61, %63 : vector<10x128xf32>
    %65 = vector.broadcast %5 : vector<1x128xf32> to vector<10x128xf32>
    %66 = arith.mulf %64, %65 : vector<10x128xf32>
    %c32 = arith.constant 32 : index
    %c16_23 = arith.constant 16 : index
    %67 = vector.load %arg1[%c32, %c16_23] : memref<104x128xf32, #tpu.memory_space<vmem>>, vector<10x1xf32>
    %c32_24 = arith.constant 32 : index
    %c17_25 = arith.constant 17 : index
    %68 = vector.load %arg1[%c32_24, %c17_25] : memref<104x128xf32, #tpu.memory_space<vmem>>, vector<10x1xf32>
    %cst_26 = arith.constant dense<0.000000e+00> : vector<10xf32>
    %69 = vector.multi_reduction <add>, %66, %cst_26 [1] : vector<10x128xf32> to vector<10xf32>
    %70 = vector.shape_cast %69 : vector<10xf32> to vector<10x1xf32>
    %cst_27 = arith.constant 1.250000e-01 : f32
    %71 = vector.broadcast %cst_27 : f32 to vector<10x1xf32>
    %72 = arith.mulf %70, %71 : vector<10x1xf32>
    %73 = vector.broadcast %72 : vector<10x1xf32> to vector<10x128xf32>
    %74 = arith.subf %66, %73 : vector<10x128xf32>
    %75 = vector.broadcast %5 : vector<1x128xf32> to vector<10x128xf32>
    %76 = arith.mulf %74, %75 : vector<10x128xf32>
    %77 = arith.mulf %76, %76 : vector<10x128xf32>
    %cst_28 = arith.constant dense<0.000000e+00> : vector<10xf32>
    %78 = vector.multi_reduction <add>, %77, %cst_28 [1] : vector<10x128xf32> to vector<10xf32>
    %79 = vector.shape_cast %78 : vector<10xf32> to vector<10x1xf32>
    %cst_29 = arith.constant 1.250000e-01 : f32
    %80 = vector.broadcast %cst_29 : f32 to vector<10x1xf32>
    %81 = arith.mulf %79, %80 : vector<10x1xf32>
    %cst_30 = arith.constant 9.99999974E-6 : f32
    %82 = vector.broadcast %cst_30 : f32 to vector<10x1xf32>
    %83 = arith.addf %81, %82 : vector<10x1xf32>
    %84 = math.rsqrt %83 : vector<10x1xf32>
    %85 = arith.mulf %67, %84 : vector<10x1xf32>
    %c32_31 = arith.constant 32 : index
    %c0_32 = arith.constant 0 : index
    %86 = vector.load %arg1[%c32_31, %c0_32] : memref<104x128xf32, #tpu.memory_space<vmem>>, vector<10x10xf32>
    %87 = vector.broadcast %85 : vector<10x1xf32> to vector<10x10xf32>
    %88 = arith.mulf %86, %87 : vector<10x10xf32>
    %cst_33 = arith.constant dense<0.000000e+00> : vector<10x128xf32>
    %89 = tpu.matmul %88, %76, %cst_33 {dimension_numbers = #tpu.dot_dimension_numbers<[0], [0], [1], [1], [0, 1, 1, 1], [], []>} : vector<10x10xf32>, vector<10x128xf32>, vector<10x128xf32> -> vector<10x128xf32>
    %90 = vector.broadcast %68 : vector<10x1xf32> to vector<10x128xf32>
    %91 = arith.addf %89, %90 : vector<10x128xf32>
    %cst_34 = arith.constant 0.00999999977 : f32
    %92 = vector.broadcast %cst_34 : f32 to vector<10x128xf32>
    %93 = arith.mulf %92, %91 : vector<10x128xf32>
    %94 = arith.maximumf %91, %93 : vector<10x128xf32>
    %95 = vector.broadcast %5 : vector<1x128xf32> to vector<10x128xf32>
    %96 = arith.mulf %94, %95 : vector<10x128xf32>
    %c48 = arith.constant 48 : index
    %c16_35 = arith.constant 16 : index
    %97 = vector.load %arg1[%c48, %c16_35] : memref<104x128xf32, #tpu.memory_space<vmem>>, vector<10x1xf32>
    %c48_36 = arith.constant 48 : index
    %c17_37 = arith.constant 17 : index
    %98 = vector.load %arg1[%c48_36, %c17_37] : memref<104x128xf32, #tpu.memory_space<vmem>>, vector<10x1xf32>
    %cst_38 = arith.constant dense<0.000000e+00> : vector<10xf32>
    %99 = vector.multi_reduction <add>, %96, %cst_38 [1] : vector<10x128xf32> to vector<10xf32>
    %100 = vector.shape_cast %99 : vector<10xf32> to vector<10x1xf32>
    %cst_39 = arith.constant 1.250000e-01 : f32
    %101 = vector.broadcast %cst_39 : f32 to vector<10x1xf32>
    %102 = arith.mulf %100, %101 : vector<10x1xf32>
    %103 = vector.broadcast %102 : vector<10x1xf32> to vector<10x128xf32>
    %104 = arith.subf %96, %103 : vector<10x128xf32>
    %105 = vector.broadcast %5 : vector<1x128xf32> to vector<10x128xf32>
    %106 = arith.mulf %104, %105 : vector<10x128xf32>
    %107 = arith.mulf %106, %106 : vector<10x128xf32>
    %cst_40 = arith.constant dense<0.000000e+00> : vector<10xf32>
    %108 = vector.multi_reduction <add>, %107, %cst_40 [1] : vector<10x128xf32> to vector<10xf32>
    %109 = vector.shape_cast %108 : vector<10xf32> to vector<10x1xf32>
    %cst_41 = arith.constant 1.250000e-01 : f32
    %110 = vector.broadcast %cst_41 : f32 to vector<10x1xf32>
    %111 = arith.mulf %109, %110 : vector<10x1xf32>
    %cst_42 = arith.constant 9.99999974E-6 : f32
    %112 = vector.broadcast %cst_42 : f32 to vector<10x1xf32>
    %113 = arith.addf %111, %112 : vector<10x1xf32>
    %114 = math.rsqrt %113 : vector<10x1xf32>
    %115 = arith.mulf %97, %114 : vector<10x1xf32>
    %c48_43 = arith.constant 48 : index
    %c0_44 = arith.constant 0 : index
    %116 = vector.load %arg1[%c48_43, %c0_44] : memref<104x128xf32, #tpu.memory_space<vmem>>, vector<10x10xf32>
    %117 = vector.broadcast %115 : vector<10x1xf32> to vector<10x10xf32>
    %118 = arith.mulf %116, %117 : vector<10x10xf32>
    %cst_45 = arith.constant dense<0.000000e+00> : vector<10x128xf32>
    %119 = tpu.matmul %118, %106, %cst_45 {dimension_numbers = #tpu.dot_dimension_numbers<[0], [0], [1], [1], [0, 1, 1, 1], [], []>} : vector<10x10xf32>, vector<10x128xf32>, vector<10x128xf32> -> vector<10x128xf32>
    %120 = vector.broadcast %98 : vector<10x1xf32> to vector<10x128xf32>
    %121 = arith.addf %119, %120 : vector<10x128xf32>
    %cst_46 = arith.constant 0.00999999977 : f32
    %122 = vector.broadcast %cst_46 : f32 to vector<10x128xf32>
    %123 = arith.mulf %122, %121 : vector<10x128xf32>
    %124 = arith.maximumf %121, %123 : vector<10x128xf32>
    %125 = vector.broadcast %5 : vector<1x128xf32> to vector<10x128xf32>
    %126 = arith.mulf %124, %125 : vector<10x128xf32>
    %c64 = arith.constant 64 : index
    %c16_47 = arith.constant 16 : index
    %127 = vector.load %arg1[%c64, %c16_47] : memref<104x128xf32, #tpu.memory_space<vmem>>, vector<10x1xf32>
    %c64_48 = arith.constant 64 : index
    %c17_49 = arith.constant 17 : index
    %128 = vector.load %arg1[%c64_48, %c17_49] : memref<104x128xf32, #tpu.memory_space<vmem>>, vector<10x1xf32>
    %cst_50 = arith.constant dense<0.000000e+00> : vector<10xf32>
    %129 = vector.multi_reduction <add>, %126, %cst_50 [1] : vector<10x128xf32> to vector<10xf32>
    %130 = vector.shape_cast %129 : vector<10xf32> to vector<10x1xf32>
    %cst_51 = arith.constant 1.250000e-01 : f32
    %131 = vector.broadcast %cst_51 : f32 to vector<10x1xf32>
    %132 = arith.mulf %130, %131 : vector<10x1xf32>
    %133 = vector.broadcast %132 : vector<10x1xf32> to vector<10x128xf32>
    %134 = arith.subf %126, %133 : vector<10x128xf32>
    %135 = vector.broadcast %5 : vector<1x128xf32> to vector<10x128xf32>
    %136 = arith.mulf %134, %135 : vector<10x128xf32>
    %137 = arith.mulf %136, %136 : vector<10x128xf32>
    %cst_52 = arith.constant dense<0.000000e+00> : vector<10xf32>
    %138 = vector.multi_reduction <add>, %137, %cst_52 [1] : vector<10x128xf32> to vector<10xf32>
    %139 = vector.shape_cast %138 : vector<10xf32> to vector<10x1xf32>
    %cst_53 = arith.constant 1.250000e-01 : f32
    %140 = vector.broadcast %cst_53 : f32 to vector<10x1xf32>
    %141 = arith.mulf %139, %140 : vector<10x1xf32>
    %cst_54 = arith.constant 9.99999974E-6 : f32
    %142 = vector.broadcast %cst_54 : f32 to vector<10x1xf32>
    %143 = arith.addf %141, %142 : vector<10x1xf32>
    %144 = math.rsqrt %143 : vector<10x1xf32>
    %145 = arith.mulf %127, %144 : vector<10x1xf32>
    %c64_55 = arith.constant 64 : index
    %c0_56 = arith.constant 0 : index
    %146 = vector.load %arg1[%c64_55, %c0_56] : memref<104x128xf32, #tpu.memory_space<vmem>>, vector<10x10xf32>
    %147 = vector.broadcast %145 : vector<10x1xf32> to vector<10x10xf32>
    %148 = arith.mulf %146, %147 : vector<10x10xf32>
    %cst_57 = arith.constant dense<0.000000e+00> : vector<10x128xf32>
    %149 = tpu.matmul %148, %136, %cst_57 {dimension_numbers = #tpu.dot_dimension_numbers<[0], [0], [1], [1], [0, 1, 1, 1], [], []>} : vector<10x10xf32>, vector<10x128xf32>, vector<10x128xf32> -> vector<10x128xf32>
    %150 = vector.broadcast %128 : vector<10x1xf32> to vector<10x128xf32>
    %151 = arith.addf %149, %150 : vector<10x128xf32>
    %cst_58 = arith.constant 0.00999999977 : f32
    %152 = vector.broadcast %cst_58 : f32 to vector<10x128xf32>
    %153 = arith.mulf %152, %151 : vector<10x128xf32>
    %154 = arith.maximumf %151, %153 : vector<10x128xf32>
    %155 = vector.broadcast %5 : vector<1x128xf32> to vector<10x128xf32>
    %156 = arith.mulf %154, %155 : vector<10x128xf32>
    %c80 = arith.constant 80 : index
    %c16_59 = arith.constant 16 : index
    %157 = vector.load %arg1[%c80, %c16_59] : memref<104x128xf32, #tpu.memory_space<vmem>>, vector<10x1xf32>
    %c80_60 = arith.constant 80 : index
    %c17_61 = arith.constant 17 : index
    %158 = vector.load %arg1[%c80_60, %c17_61] : memref<104x128xf32, #tpu.memory_space<vmem>>, vector<5x1xf32>
    %cst_62 = arith.constant dense<0.000000e+00> : vector<10xf32>
    %159 = vector.multi_reduction <add>, %156, %cst_62 [1] : vector<10x128xf32> to vector<10xf32>
    %160 = vector.shape_cast %159 : vector<10xf32> to vector<10x1xf32>
    %cst_63 = arith.constant 1.250000e-01 : f32
    %161 = vector.broadcast %cst_63 : f32 to vector<10x1xf32>
    %162 = arith.mulf %160, %161 : vector<10x1xf32>
    %163 = vector.broadcast %162 : vector<10x1xf32> to vector<10x128xf32>
    %164 = arith.subf %156, %163 : vector<10x128xf32>
    %165 = vector.broadcast %5 : vector<1x128xf32> to vector<10x128xf32>
    %166 = arith.mulf %164, %165 : vector<10x128xf32>
    %167 = arith.mulf %166, %166 : vector<10x128xf32>
    %cst_64 = arith.constant dense<0.000000e+00> : vector<10xf32>
    %168 = vector.multi_reduction <add>, %167, %cst_64 [1] : vector<10x128xf32> to vector<10xf32>
    %169 = vector.shape_cast %168 : vector<10xf32> to vector<10x1xf32>
    %cst_65 = arith.constant 1.250000e-01 : f32
    %170 = vector.broadcast %cst_65 : f32 to vector<10x1xf32>
    %171 = arith.mulf %169, %170 : vector<10x1xf32>
    %cst_66 = arith.constant 9.99999974E-6 : f32
    %172 = vector.broadcast %cst_66 : f32 to vector<10x1xf32>
    %173 = arith.addf %171, %172 : vector<10x1xf32>
    %174 = math.rsqrt %173 : vector<10x1xf32>
    %175 = arith.mulf %157, %174 : vector<10x1xf32>
    %c80_67 = arith.constant 80 : index
    %c0_68 = arith.constant 0 : index
    %176 = vector.load %arg1[%c80_67, %c0_68] : memref<104x128xf32, #tpu.memory_space<vmem>>, vector<10x5xf32>
    %177 = vector.broadcast %175 : vector<10x1xf32> to vector<10x5xf32>
    %178 = arith.mulf %176, %177 : vector<10x5xf32>
    %cst_69 = arith.constant dense<0.000000e+00> : vector<5x128xf32>
    %179 = tpu.matmul %178, %166, %cst_69 {dimension_numbers = #tpu.dot_dimension_numbers<[0], [0], [1], [1], [0, 1, 1, 1], [], []>} : vector<10x5xf32>, vector<10x128xf32>, vector<5x128xf32> -> vector<5x128xf32>
    %180 = vector.broadcast %158 : vector<5x1xf32> to vector<5x128xf32>
    %181 = arith.addf %179, %180 : vector<5x128xf32>
    %cst_70 = arith.constant 0.00999999977 : f32
    %182 = vector.broadcast %cst_70 : f32 to vector<5x128xf32>
    %183 = arith.mulf %182, %181 : vector<5x128xf32>
    %184 = arith.maximumf %181, %183 : vector<5x128xf32>
    %185 = vector.broadcast %5 : vector<1x128xf32> to vector<5x128xf32>
    %186 = arith.mulf %184, %185 : vector<5x128xf32>
    %c96 = arith.constant 96 : index
    %c16_71 = arith.constant 16 : index
    %187 = vector.load %arg1[%c96, %c16_71] : memref<104x128xf32, #tpu.memory_space<vmem>>, vector<5x1xf32>
    %c96_72 = arith.constant 96 : index
    %c17_73 = arith.constant 17 : index
    %188 = vector.load %arg1[%c96_72, %c17_73] : memref<104x128xf32, #tpu.memory_space<vmem>>, vector<1x1xf32>
    %cst_74 = arith.constant dense<0.000000e+00> : vector<5xf32>
    %189 = vector.multi_reduction <add>, %186, %cst_74 [1] : vector<5x128xf32> to vector<5xf32>
    %190 = vector.shape_cast %189 : vector<5xf32> to vector<5x1xf32>
    %cst_75 = arith.constant 1.250000e-01 : f32
    %191 = vector.broadcast %cst_75 : f32 to vector<5x1xf32>
    %192 = arith.mulf %190, %191 : vector<5x1xf32>
    %193 = vector.broadcast %192 : vector<5x1xf32> to vector<5x128xf32>
    %194 = arith.subf %186, %193 : vector<5x128xf32>
    %195 = vector.broadcast %5 : vector<1x128xf32> to vector<5x128xf32>
    %196 = arith.mulf %194, %195 : vector<5x128xf32>
    %197 = arith.mulf %196, %196 : vector<5x128xf32>
    %cst_76 = arith.constant dense<0.000000e+00> : vector<5xf32>
    %198 = vector.multi_reduction <add>, %197, %cst_76 [1] : vector<5x128xf32> to vector<5xf32>
    %199 = vector.shape_cast %198 : vector<5xf32> to vector<5x1xf32>
    %cst_77 = arith.constant 1.250000e-01 : f32
    %200 = vector.broadcast %cst_77 : f32 to vector<5x1xf32>
    %201 = arith.mulf %199, %200 : vector<5x1xf32>
    %cst_78 = arith.constant 9.99999974E-6 : f32
    %202 = vector.broadcast %cst_78 : f32 to vector<5x1xf32>
    %203 = arith.addf %201, %202 : vector<5x1xf32>
    %204 = math.rsqrt %203 : vector<5x1xf32>
    %205 = arith.mulf %187, %204 : vector<5x1xf32>
    %c96_79 = arith.constant 96 : index
    %c0_80 = arith.constant 0 : index
    %206 = vector.load %arg1[%c96_79, %c0_80] : memref<104x128xf32, #tpu.memory_space<vmem>>, vector<5x1xf32>
    %207 = arith.mulf %206, %205 : vector<5x1xf32>
    %208 = vector.broadcast %207 : vector<5x1xf32> to vector<5x128xf32>
    %209 = arith.mulf %208, %196 : vector<5x128xf32>
    %cst_81 = arith.constant dense<0.000000e+00> : vector<128xf32>
    %210 = vector.multi_reduction <add>, %209, %cst_81 [0] : vector<5x128xf32> to vector<128xf32>
    %211 = vector.shape_cast %210 : vector<128xf32> to vector<1x128xf32>
    %212 = vector.broadcast %188 : vector<1x1xf32> to vector<1x128xf32>
    %213 = arith.addf %211, %212 : vector<1x128xf32>
    %cst_82 = arith.constant 0.00999999977 : f32
    %214 = vector.broadcast %cst_82 : f32 to vector<1x128xf32>
    %215 = arith.mulf %214, %213 : vector<1x128xf32>
    %216 = arith.maximumf %213, %215 : vector<1x128xf32>
    %c0_83 = arith.constant 0 : index
    %c0_84 = arith.constant 0 : index
    %217 = vector.load %arg2[%c0_83, %c0_84] : memref<1x128xf32, #tpu.memory_space<vmem>>, vector<1x128xf32>
    tpu.vector_store %arg2[%c0_83, %c0_84], %216 {strides = array<i32>} : memref<1x128xf32, #tpu.memory_space<vmem>>, vector<1x128xf32>,
    return
  }
}

</mosaic_0001>

<bundles_post_ra>
// kernel: tpu_custom_call.1
= control target key start
LH: loop header
LB: loop body
LE: loop exit
PB: predicated region body
PF: predicated region fallthrough
CT: control target
= control target key end

     0   :  { %7 = vsyncpa [#allocation3], 0  ;;  %s1390_s0 = inlined_call_operand.hbm [shape: f32[1,128], index: 0, kind: input, shape index: {}]   ;;  %s1391_s1 = inlined_call_operand.hbm [shape: f32[104,128], index: 1, kind: input, shape index: {}]   ;;  %s1392_s2 = inlined_call_operand.hbm [shape: f32[1,128], index: 2, kind: output, shape index: {}]  }
   0x1   :  { %8 = vsyncpa [#allocation6], 0 }
   0x2   :  { %9 = vsyncpa [#allocation4], 0  ;;  %s1230_s9 = smov [#allocation2]   ;;  %s1231_s11 = smov [#allocation5]  }
   0x3   :  { %s16_s10 = sshll.u32 %s1230_s9, 4  ;;  %s25_s12 = sshll.u32 %s1231_s11, 4  ;;  %s17_s10 = int_to_ptr.vmem [resolvable:$true] %s16_s10  ;;  %s1258_s12 = int_to_ptr.vmem [resolvable:$true] %s25_s12 }
   0x4   :  { %s1158_s15 = scalar_lea.hbm %s1390_s0, 16 }
   0x5   :  { %p1159_p0 = scmp.ne.s32.totalorder %s1390_s0, %s1158_s15  ;;  %p1162_p1 = scmp.lt.u32.totalorder %s1158_s15, %s1390_s0 }
   0x7   :  { %p1164_p2 = pnand %p1162_p1, %p1159_p0 }
   0x9   :  { %1167 = shalt.err (!%p1164_p2)
}
   0xa   :  { %s1168_s20 = scalar_lea.vmem %s17_s10, 16  ;;  %s1172_s21 = scalar_lea.vmem %s17_s10, 32 }
   0xb   :  { %p1169_p3 = scmp.ne.s32.totalorder %s17_s10, %s1168_s20  ;;  %p1173_p4 = scmp.lt.s32.totalorder %s17_s10, %s17_s10 }
   0xc   :  { %p1174_p5 = scmp.lt.s32.totalorder %s1172_s21, %s1168_s20 }
   0xe   :  { %p1175_p6 = por %p1174_p5, %p1173_p4 }
  0x10   :  { %p1176_p7 = pnand %p1175_p6, %p1169_p3 }
  0x12   :  { %1179 = shalt.err (!%p1176_p7)
}
  0x13   :  { %19 = dma.hbm_to_vmem [thread:$0]  %s1390_s0, 16, %s17_s10, [#allocation3]  }
  0x14   :  { %s1180_s26 = scalar_lea.hbm %s1391_s1, 1664 }
  0x15   :  { %p1181_p8 = scmp.ne.s32.totalorder %s1391_s1, %s1180_s26  ;;  %p1184_p9 = scmp.lt.u32.totalorder %s1180_s26, %s1391_s1 }
  0x17   :  { %p1186_p10 = pnand %p1184_p9, %p1181_p8 }
  0x19   :  { %1189 = shalt.err (!%p1186_p10)
}
  0x1a   :  { %s1190_s3 = scalar_lea.vmem %s1258_s12, 1664  ;;  %p1195_p12 = scmp.lt.s32.totalorder %s1258_s12, %s1258_s12 }
  0x1b   :  { %p1191_p11 = scmp.ne.s32.totalorder %s1258_s12, %s1190_s3  ;;  %p1196_p13 = scmp.lt.s32.totalorder %s1190_s3, %s1190_s3 }
  0x1d   :  { %p1197_p0 = por %p1196_p13, %p1195_p12 }
  0x1f   :  { %p1198_p1 = pnand %p1197_p0, %p1191_p11 }
  0x21   :  { %1201 = shalt.err (!%p1198_p1)
}
  0x22   :  { %s1232_s0 = smov 128   ;;  %s1233_s4 = smov 8  }
  0x23   :  { %31 = dma.hbm_to_vmem [thread:$0]  %s1391_s1, 1664, %s1258_s12, [#allocation6], %s1232_s0, %s1232_s0, %s1233_s4  }
  0x24   :  { %1224 = dma.done.wait [#allocation3], 16  }
  0x25   :  { %1225 = vsyncadd [#allocation3], 4294967280 }
  0x26   :  { %1226 = dma.done.wait [#allocation6], 1664  }
  0x27   :  { %1227 = vsyncadd [#allocation6], 4294965632  ;;  %vm47_vm0 = vcmask 1040384   ;;  %v38_v0 = vld [vmem:[#allocation2] sm:$0x1]  ;;  %v39_v2 = vlaneseq  ;;  %v1234_v6 = vmov 0.0  }
  0x28   :  { %v48_v1 = vsel %vm47_vm0, %v38_v0, 0.0  ;;  %v45_v12 = vld [vmem:[#allocation5] sm:$0xff]  ;;  %v1235_v13 = vmov 0   ;;  %v1236_v14 = vmov 16   ;;  %v46_v15 = vld [vmem:[#allocation5 + $0x8] sm:$0x3] }
  0x29   :  { %49 = vadd.xlane.f32.xlu0 %v48_v1  ;;  %v40_v3 = vand.u32 127, %v39_v2  ;;  %1117 = vset.pattern.permute.xlu1 %v1235_v13  ;;  %v1237_v16 = vmov 17   ;;  %v44_v20 = vld [vmem:[#allocation5] sm:$0x1]  ;;  %v79_v24 = vshrl.u32 %v39_v2, 7  ;;  %vm104_vm2 = vcmask 1041408  }
  0x2a   :  { %1118 = vset.pattern.permute.xlu0 %v1235_v13  ;;  %70 = vperm.xlu1 %1117, %v45_v12   ;;  %vm1238_vm3 = vmmov 1   ;;  %v100_v56 = vld [vmem:[#allocation5 + $0x10] sm:$0xff]  ;;  %v101_v1 = vld [vmem:[#allocation5 + $0x18] sm:$0x3]  ;;  %vm183_vm5 = vcmask 80896   ;;  %vm1240_vm6 = vmmov 0  }
  0x2b   :  { %vm41_vm1 = vcmp.lt.s32.totalorder %v40_v3, 8  ;;  %v80_v25 = vsub.s32 0, %v79_v24  ;;  %vm1305_vm4 = vmpackc.low %vm104_vm2, %vm1238_vm3  ;;  %vm949_vm7 = vcmask 1044480   ;;  %s1241_s1 = smov 112   ;;  %s1242_s7 = smov [#allocation7]  }
  0x2c   :  { %v1290_v7 = vsel %vm41_vm1, 1.0, %v1234_v6  ;;  %s997_s8 = sshll.u32 %s1242_s7, 4  ;;  %s998_s8 = int_to_ptr.vmem [resolvable:$true] %s997_s8 }
  0x2d   :  { %s1202_s9 = scalar_lea.vmem %s998_s8, 16  ;;  %s1206_s10 = scalar_lea.vmem %s998_s8, 32 }
  0x2e   :  { %1119 = vset.pattern.permute.xlu1 %v1236_v14  ;;  %p1203_p2 = scmp.ne.s32.totalorder %s998_s8, %s1202_s9  ;;  %p1207_p3 = scmp.lt.s32.totalorder %s998_s8, %s998_s8 }
  0x2f   :  { %p1208_p4 = scmp.lt.s32.totalorder %s1206_s10, %s1202_s9 }
  0x31   :  { %p1209_p5 = por %p1208_p4, %p1207_p3 }
  0x33   :  { %p1210_p6 = pnand %p1209_p5, %p1203_p2 }
  0xa9   :  { %v71_v23 = vpop.permute.xlu1 %70 }
  0xb6   :  { %v50_v4 = vpop.xlane.xlu0 %49 }
  0xb7   :  { %v51_v5 = vmul.f32 0.125, %v50_v4 }
  0xb9   :  { %v52_v8 = vsub.f32 %v38_v0, %v51_v5 }
  0xbb   :  { %v53_v9 = vmul.f32 %v1290_v7, %v52_v8 }
  0xbd   :  { %v54_v10 = vmul.f32 %v53_v9, %v53_v9 }
  0xbf   :  { %v55_v11 = vsel %vm47_vm0, %v54_v10, 0.0 }
  0xc0   :  { %56 = vadd.xlane.f32.xlu0 %v55_v11 }
  0xd6   :  { %75 = vperm.xlu0 %1118, %v46_v15  }
  0xda   :  { %1122 = vset.pattern.permute.xlu0 %v1237_v16 }
 0x14d   :  { %v57_v17 = vpop.xlane.xlu0 %56 }
 0x14e   :  { %v58_v18 = vmul.f32 0.125, %v57_v17 }
 0x150   :  { %v59_v19 = vadd.f32 1e-05, %v58_v18 }
 0x152   :  { %1134 = vrsqrt.f32 %v59_v19 }
 0x155   :  { %v76_v29 = vpop.permute.xlu0 %75 }
 0x15c   :  { %v1135_v21 = vpop.eup %1134 }
 0x15d   :  { %v61_v22 = vmul.f32 %v1135_v21, %v44_v20 }
 0x15f   :  { %64 = vperm.xlu1 %1119, %v61_v22  }
 0x163   :  { %1120 = vset.pattern.permute.xlu1 %v1237_v16 }
 0x164   :  { %85 = vperm.xlu1 %1120, %v45_v12  }
 0x168   :  { %89 = vperm.xlu1 %1120, %v46_v15  }
 0x16c   :  { %1121 = vset.pattern.permute.xlu1 %v1236_v14 }
 0x1de   :  { %v65_v26 = vpop.permute.xlu1 %64 }
 0x1df   :  { %v67_v27 = vmul.f32 %v65_v26, %v53_v9 }
 0x1e1   :  { %v81_v28 = vrot.slane %v67_v27, %v80_v25 }
 0x1e3   :  { %v82_v30 = vmul.f32 %v81_v28, %v71_v23  ;;  %v86_v31 = vpop.permute.xlu1 %85  ;;  %v83_v33 = vmul.f32 %v81_v28, %v76_v29 }
 0x1e5   :  { %v92_v32 = vadd.f32 %v86_v31, %v82_v30 }
 0x1e7   :  { %v94_v34 = vmul.f32 0.01, %v92_v32  ;;  %v90_v35 = vpop.permute.xlu1 %89 }
 0x1e8   :  { %v93_v36 = vadd.f32 %v90_v35, %v83_v33 }
 0x1e9   :  { %v96_v37 = vmax.f32 %v92_v32, %v94_v34 }
 0x1ea   :  { %v95_v38 = vmul.f32 0.01, %v93_v36 }
 0x1eb   :  { %v98_v39 = vmul.f32 %v1290_v7, %v96_v37 }
 0x1ec   :  { %v97_v40 = vmax.f32 %v93_v36, %v95_v38 }
 0x1ed   :  { %102 = vadd.xlane.f32.xlu1 %v98_v39 }
 0x1ee   :  { %v99_v41 = vmul.f32 %v1290_v7, %v97_v40 }
 0x1f0   :  { %v105_v42 = vsel %vm104_vm2, %v99_v41, 0.0 }
 0x1f1   :  { %106 = vadd.xlane.f32.xlu0 %v105_v42 }
 0x207   :  { %143 = vperm.xlu0 %1122, %v100_v56  }
 0x20b   :  { %1124 = vset.pattern.permute.xlu0 %v1236_v14 }
 0x27a   :  { %v103_v43 = vpop.xlane.xlu1 %102 }
 0x27b   :  { %v108_v44 = vmul.f32 0.125, %v103_v43 }
 0x27d   :  { %v110_v45 = vsub.f32 %v98_v39, %v108_v44 }
 0x27e   :  { %v107_v46 = vpop.xlane.xlu0 %106 }
 0x27f   :  { %v109_v47 = vmul.f32 0.125, %v107_v46  ;;  %v112_v48 = vmul.f32 %v1290_v7, %v110_v45  ;;  %v274_v46 = vld [vmem:[#allocation5 + $0x20] sm:$0xff] }
 0x281   :  { %v111_v49 = vsub.f32 %v99_v41, %v109_v47  ;;  %v114_v50 = vmul.f32 %v112_v48, %v112_v48 }
 0x283   :  { %116 = vadd.xlane.f32.xlu1 %v114_v50  ;;  %v113_v51 = vmul.f32 %v1290_v7, %v111_v49  ;;  %v275_v49 = vld [vmem:[#allocation5 + $0x28] sm:$0x3] }
 0x285   :  { %v1076_v53 = vpack.c.bf16 %v113_v51, %v112_v48  ;;  %v115_v54 = vmul.f32 %v113_v51, %v113_v51 }
 0x286   :  { %v144_v15 = vpop.permute.xlu0 %143 }
 0x287   :  { %1078 = vmatprep.subr.msk.bf16.mxu0 %vm1305_vm4, %v1076_v53  ;;  %v118_v55 = vsel %vm104_vm2, %v115_v54, 0.0 }
 0x288   :  { %1081 = vmatpush3.bf16.msk.msra.mxu0 %vm1305_vm4, %v1076_v53  ;;  %119 = vadd.xlane.f32.xlu1 %v118_v55 }
 0x310   :  { %v117_v57 = vpop.xlane.xlu1 %116 }
 0x311   :  { %v121_v58 = vmul.f32 0.125, %v117_v57 }
 0x313   :  { %v123_v59 = vadd.f32 1e-05, %v121_v58 }
 0x315   :  { %1136 = vrsqrt.f32 %v123_v59  ;;  %v120_v60 = vpop.xlane.xlu1 %119 }
 0x316   :  { %v122_v61 = vmul.f32 0.125, %v120_v60 }
 0x318   :  { %v124_v62 = vadd.f32 1e-05, %v122_v61 }
 0x31a   :  { %1138 = vrsqrt.f32 %v124_v62 }
 0x31f   :  { %v1137_v63 = vpop.eup %1136 }
 0x320   :  { %v127_v0 = vmul.f32 %v1137_v63, %v100_v56 }
 0x322   :  { %131 = vperm.xlu1 %1121, %v127_v0  }
 0x324   :  { %v1139_v2 = vpop.eup %1138 }
 0x325   :  { %v128_v3 = vmul.f32 %v1139_v2, %v101_v1 }
 0x327   :  { %136 = vperm.xlu1 %1121, %v128_v3  }
 0x3a1   :  { %v132_v4 = vpop.permute.xlu1 %131 }
 0x3a2   :  { %v139_v5 = vmul.f32 %v132_v4, %v100_v56 }
 0x3a4   :  { %151 = vxpose.xlu1.b32.start [1/2] (short) (narrow) %v139_v5, 16 }
 0x3a6   :  { %v137_v8 = vpop.permute.xlu1 %136 }
 0x3a7   :  { %v140_v9 = vmul.f32 %v137_v8, %v101_v1 }
 0x3a9   :  { %152 = vxpose.xlu1.b32.end [2/2] (short) (narrow) %v140_v9, 16 }
 0x3c7   :  { %1123 = vset.pattern.permute.xlu1 %v1237_v16 }
 0x3c8   :  { %148 = vperm.xlu1 %1123, %v101_v1  }
 0x3cc   :  { %1125 = vset.pattern.permute.xlu1 %v1236_v14 }
 0x425   :  { %v167_v10 = vpop.trf.xlu1 }
 0x426   :  { %1045 = vmatprep.mubr.msk.f32.mxu0 %vm183_vm5, %v167_v10 }
 0x429   :  { %v168_v11 = vpop.trf.xlu1 }
 0x42a   :  { %1046 = vmatmul.mubr.msk.f32.vlgmr.msra.gmra.mrb[0].mxu0 %vm183_vm5, %v168_v11 }
 0x447   :  { %v149_v12 = vpop.permute.xlu1 %148 }
 0x4fd   :  { %v1047_v17 = vpop.f32.mrb[0].mxu0 }
 0x4fe   :  { %v265_v18 = vadd.f32 %v1047_v17, %v149_v12  ;;  %v259_v19 = vpop.f32.mrb[1].mxu0 }
 0x4ff   :  { %v260_v20 = vadd.f32 %v259_v19, %v144_v15 }
 0x500   :  { %v269_v21 = vmul.f32 0.01, %v265_v18 }
 0x501   :  { %v268_v22 = vmul.f32 0.01, %v260_v20 }
 0x502   :  { %v271_v23 = vmax.f32 %v265_v18, %v269_v21 }
 0x503   :  { %v270_v24 = vmax.f32 %v260_v20, %v268_v22 }
 0x504   :  { %v273_v25 = vmul.f32 %v1290_v7, %v271_v23 }
 0x505   :  { %v272_v26 = vmul.f32 %v1290_v7, %v270_v24 }
 0x506   :  { %v278_v27 = vsel %vm104_vm2, %v273_v25, 0.0 }
 0x507   :  { %279 = vadd.xlane.f32.xlu1 %v278_v27  ;;  %276 = vadd.xlane.f32.xlu0 %v272_v26 }
 0x594   :  { %v280_v28 = vpop.xlane.xlu1 %279  ;;  %v277_v29 = vpop.xlane.xlu0 %276 }
 0x595   :  { %v282_v30 = vmul.f32 0.125, %v280_v28  ;;  %v281_v31 = vmul.f32 0.125, %v277_v29 }
 0x597   :  { %v284_v32 = vsub.f32 %v273_v25, %v282_v30  ;;  %v283_v33 = vsub.f32 %v272_v26, %v281_v31  ;;  %v446_v31 = vld [vmem:[#allocation5 + $0x30] sm:$0xff] }
 0x599   :  { %v285_v34 = vmul.f32 %v1290_v7, %v283_v33  ;;  %v286_v35 = vmul.f32 %v1290_v7, %v284_v32 }
 0x59b   :  { %v1082_v36 = vpack.c.bf16 %v286_v35, %v285_v34  ;;  %v287_v37 = vmul.f32 %v285_v34, %v285_v34  ;;  %v288_v38 = vmul.f32 %v286_v35, %v286_v35  ;;  %v447_v34 = vld [vmem:[#allocation5 + $0x38] sm:$0x3] }
 0x59d   :  { %1084 = vmatprep.subr.msk.bf16.mxu1 %vm1305_vm4, %v1082_v36  ;;  %289 = vadd.xlane.f32.xlu0 %v287_v37  ;;  %v291_v39 = vsel %vm104_vm2, %v288_v38, 0.0 }
 0x59e   :  { %1087 = vmatpush3.bf16.msk.msra.mxu1 %vm1305_vm4, %v1082_v36 }
 0x5a1   :  { %292 = vadd.xlane.f32.xlu0 %v291_v39 }
 0x62a   :  { %v290_v40 = vpop.xlane.xlu0 %289 }
 0x62b   :  { %v294_v41 = vmul.f32 0.125, %v290_v40 }
 0x62d   :  { %v296_v42 = vadd.f32 1e-05, %v294_v41 }
 0x62e   :  { %v293_v43 = vpop.xlane.xlu0 %292 }
 0x62f   :  { %1140 = vrsqrt.f32 %v296_v42  ;;  %v295_v44 = vmul.f32 0.125, %v293_v43 }
 0x631   :  { %v297_v45 = vadd.f32 1e-05, %v295_v44 }
 0x633   :  { %1142 = vrsqrt.f32 %v297_v45 }
 0x639   :  { %v1141_v47 = vpop.eup %1140 }
 0x63a   :  { %v300_v48 = vmul.f32 %v1141_v47, %v274_v46 }
 0x63c   :  { %304 = vperm.xlu0 %1124, %v300_v48  }
 0x63d   :  { %v1143_v50 = vpop.eup %1142 }
 0x63e   :  { %v301_v51 = vmul.f32 %v1143_v50, %v275_v49 }
 0x640   :  { %309 = vperm.xlu1 %1125, %v301_v51   ;;  %1126 = vset.pattern.permute.xlu0 %v1237_v16 }
 0x641   :  { %316 = vperm.xlu0 %1126, %v274_v46  }
 0x645   :  { %321 = vperm.xlu0 %1126, %v275_v49  }
 0x649   :  { %1127 = vset.pattern.permute.xlu0 %v1236_v14 }
 0x6bb   :  { %v305_v53 = vpop.permute.xlu0 %304 }
 0x6bc   :  { %v312_v54 = vmul.f32 %v305_v53, %v274_v46 }
 0x6be   :  { %324 = vxpose.xlu1.b32.start [1/2] (short) (narrow) %v312_v54, 16 }
 0x6bf   :  { %v310_v55 = vpop.permute.xlu1 %309 }
 0x6c0   :  { %v313_v56 = vmul.f32 %v310_v55, %v275_v49  ;;  %v317_v59 = vpop.permute.xlu0 %316 }
 0x6c2   :  { %325 = vxpose.xlu1.b32.end [2/2] (short) (narrow) %v313_v56, 16 }
 0x6c4   :  { %v322_v60 = vpop.permute.xlu0 %321 }
 0x73e   :  { %v340_v57 = vpop.trf.xlu1 }
 0x73f   :  { %1052 = vmatprep.mubr.msk.f32.mxu1 %vm183_vm5, %v340_v57 }
 0x742   :  { %v341_v58 = vpop.trf.xlu1 }
 0x743   :  { %1053 = vmatmul.mubr.msk.f32.vlgmr.msra.gmra.mrb[0].mxu1 %vm183_vm5, %v341_v58 }
 0x816   :  { %v1054_v61 = vpop.f32.mrb[0].mxu1 }
 0x817   :  { %v437_v62 = vadd.f32 %v1054_v61, %v322_v60  ;;  %v431_v63 = vpop.f32.mrb[1].mxu1 }
 0x818   :  { %v432_v0 = vadd.f32 %v431_v63, %v317_v59 }
 0x819   :  { %v441_v1 = vmul.f32 0.01, %v437_v62 }
 0x81a   :  { %v440_v2 = vmul.f32 0.01, %v432_v0 }
 0x81b   :  { %v443_v3 = vmax.f32 %v437_v62, %v441_v1 }
 0x81c   :  { %v442_v4 = vmax.f32 %v432_v0, %v440_v2 }
 0x81d   :  { %v445_v8 = vmul.f32 %v1290_v7, %v443_v3 }
 0x81e   :  { %v444_v5 = vmul.f32 %v1290_v7, %v442_v4 }
 0x81f   :  { %v450_v9 = vsel %vm104_vm2, %v445_v8, 0.0 }
 0x820   :  { %448 = vadd.xlane.f32.xlu0 %v444_v5 }
 0x824   :  { %451 = vadd.xlane.f32.xlu0 %v450_v9 }
 0x8ad   :  { %v449_v10 = vpop.xlane.xlu0 %448 }
 0x8ae   :  { %v453_v11 = vmul.f32 0.125, %v449_v10 }
 0x8b0   :  { %v455_v12 = vsub.f32 %v444_v5, %v453_v11  ;;  %v618_v5 = vld [vmem:[#allocation5 + $0x40] sm:$0xff] }
 0x8b1   :  { %v452_v15 = vpop.xlane.xlu0 %451 }
 0x8b2   :  { %v454_v17 = vmul.f32 0.125, %v452_v15  ;;  %v457_v18 = vmul.f32 %v1290_v7, %v455_v12 }
 0x8b4   :  { %v456_v19 = vsub.f32 %v445_v8, %v454_v17  ;;  %v459_v20 = vmul.f32 %v457_v18, %v457_v18  ;;  %v619_v8 = vld [vmem:[#allocation5 + $0x48] sm:$0x3] }
 0x8b6   :  { %v458_v21 = vmul.f32 %v1290_v7, %v456_v19  ;;  %461 = vadd.xlane.f32.xlu1 %v459_v20 }
 0x8b8   :  { %v1088_v22 = vpack.c.bf16 %v458_v21, %v457_v18  ;;  %v460_v23 = vmul.f32 %v458_v21, %v458_v21 }
 0x8ba   :  { %1090 = vmatprep.subr.msk.bf16.mxu0 %vm1305_vm4, %v1088_v22  ;;  %v463_v24 = vsel %vm104_vm2, %v460_v23, 0.0 }
 0x8bb   :  { %1093 = vmatpush3.bf16.msk.msra.mxu0 %vm1305_vm4, %v1088_v22  ;;  %464 = vadd.xlane.f32.xlu0 %v463_v24 }
 0x943   :  { %v462_v25 = vpop.xlane.xlu1 %461 }
 0x944   :  { %v466_v26 = vmul.f32 0.125, %v462_v25 }
 0x946   :  { %v468_v27 = vadd.f32 1e-05, %v466_v26 }
 0x948   :  { %1144 = vrsqrt.f32 %v468_v27  ;;  %v465_v28 = vpop.xlane.xlu0 %464 }
 0x949   :  { %v467_v29 = vmul.f32 0.125, %v465_v28 }
 0x94b   :  { %v469_v30 = vadd.f32 1e-05, %v467_v29 }
 0x94d   :  { %1146 = vrsqrt.f32 %v469_v30 }
 0x952   :  { %v1145_v32 = vpop.eup %1144 }
 0x953   :  { %v472_v33 = vmul.f32 %v1145_v32, %v446_v31 }
 0x955   :  { %476 = vperm.xlu0 %1127, %v472_v33  }
 0x957   :  { %v1147_v35 = vpop.eup %1146 }
 0x958   :  { %v473_v36 = vmul.f32 %v1147_v35, %v447_v34 }
 0x95a   :  { %481 = vperm.xlu1 %1125, %v473_v36  }
 0x95e   :  { %1128 = vset.pattern.permute.xlu1 %v1237_v16 }
 0x95f   :  { %488 = vperm.xlu1 %1128, %v446_v31  }
 0x963   :  { %493 = vperm.xlu1 %1128, %v447_v34  }
 0x967   :  { %1129 = vset.pattern.permute.xlu1 %v1236_v14 }
 0x9d4   :  { %v477_v37 = vpop.permute.xlu0 %476 }
 0x9d5   :  { %v484_v38 = vmul.f32 %v477_v37, %v446_v31 }
 0x9d7   :  { %496 = vxpose.xlu0.b32.start [1/2] (short) (narrow) %v484_v38, 16 }
 0x9d9   :  { %v482_v39 = vpop.permute.xlu1 %481 }
 0x9da   :  { %v485_v40 = vmul.f32 %v482_v39, %v447_v34 }
 0x9dc   :  { %497 = vxpose.xlu0.b32.end [2/2] (short) (narrow) %v485_v40, 16  ;;  %v1239_v40 = vmov 0.0|0.0  }
 0x9dd   :  { %1100 = vmatprep.subr.bf16.mxu0 %v1239_v40 }
 0x9de   :  { %v489_v43 = vpop.permute.xlu1 %488 }
 0x9e2   :  { %v494_v44 = vpop.permute.xlu1 %493 }
 0xa05   :  { %1130 = vset.pattern.permute.xlu0 %v1237_v16 }
 0xa58   :  { %v512_v41 = vpop.trf.xlu0 }
 0xa59   :  { %1059 = vmatprep.mubr.msk.f32.mxu0 %vm183_vm5, %v512_v41 }
 0xa5c   :  { %v513_v42 = vpop.trf.xlu0 }
 0xa5d   :  { %1060 = vmatmul.mubr.msk.f32.vlgmr.msra.gmra.mrb[2].mxu0 %vm183_vm5, %v513_v42 }
 0xa5e   :  { %1073 = vmatprep.mubr.msk.f32.mxu0 %vm1240_vm6, %v1234_v6 }
 0xb30   :  { %v1061_v45 = vpop.f32.mrb[2].mxu0 }
 0xb31   :  { %v609_v46 = vadd.f32 %v1061_v45, %v494_v44  ;;  %v603_v47 = vpop.f32.mrb[3].mxu0 }
 0xb32   :  { %v604_v48 = vadd.f32 %v603_v47, %v489_v43 }
 0xb33   :  { %v613_v49 = vmul.f32 0.01, %v609_v46 }
 0xb34   :  { %v612_v50 = vmul.f32 0.01, %v604_v48 }
 0xb35   :  { %v615_v51 = vmax.f32 %v609_v46, %v613_v49 }
 0xb36   :  { %v614_v53 = vmax.f32 %v604_v48, %v612_v50 }
 0xb37   :  { %v617_v54 = vmul.f32 %v1290_v7, %v615_v51 }
 0xb38   :  { %v616_v55 = vmul.f32 %v1290_v7, %v614_v53 }
 0xb39   :  { %v622_v56 = vsel %vm104_vm2, %v617_v54, 0.0 }
 0xb3a   :  { %623 = vadd.xlane.f32.xlu0 %v622_v56  ;;  %620 = vadd.xlane.f32.xlu1 %v616_v55 }
 0xb50   :  { %660 = vperm.xlu0 %1130, %v618_v5  }
 0xb54   :  { %665 = vperm.xlu0 %1130, %v619_v8  }
 0xb58   :  { %1131 = vset.pattern.permute.xlu0 %v1236_v14 }
 0xbc7   :  { %v624_v57 = vpop.xlane.xlu0 %623  ;;  %v621_v58 = vpop.xlane.xlu1 %620 }
 0xbc8   :  { %v626_v59 = vmul.f32 0.125, %v624_v57  ;;  %v625_v60 = vmul.f32 0.125, %v621_v58 }
 0xbca   :  { %v628_v61 = vsub.f32 %v617_v54, %v626_v59  ;;  %v627_v62 = vsub.f32 %v616_v55, %v625_v60  ;;  %v790_v60 = vld [vmem:[#allocation5 + $0x50] sm:$0xff] }
 0xbcc   :  { %v630_v63 = vmul.f32 %v1290_v7, %v628_v61  ;;  %v629_v0 = vmul.f32 %v1290_v7, %v627_v62 }
 0xbce   :  { %v1094_v1 = vpack.c.bf16 %v630_v63, %v629_v0  ;;  %v631_v2 = vmul.f32 %v629_v0, %v629_v0  ;;  %v632_v3 = vmul.f32 %v630_v63, %v630_v63  ;;  %v791_v63 = vld [vmem:[#allocation5 + $0x58] sm:$0x3] }
 0xbcf   :  { %v661_v27 = vpop.permute.xlu0 %660 }
 0xbd0   :  { %1096 = vmatprep.subr.msk.bf16.mxu1 %vm1305_vm4, %v1094_v1  ;;  %633 = vadd.xlane.f32.xlu1 %v631_v2  ;;  %v635_v4 = vsel %vm104_vm2, %v632_v3, 0.0 }
 0xbd1   :  { %1099 = vmatpush3.bf16.msk.msra.mxu1 %vm1305_vm4, %v1094_v1 }
 0xbd3   :  { %v666_v28 = vpop.permute.xlu0 %665 }
 0xbd4   :  { %636 = vadd.xlane.f32.xlu1 %v635_v4  ;;  %v792_v4 = vld [vmem:[#allocation5 + $0x50] sm:$0x1f] }
 0xc5d   :  { %v634_v9 = vpop.xlane.xlu1 %633 }
 0xc5e   :  { %v638_v10 = vmul.f32 0.125, %v634_v9 }
 0xc60   :  { %v640_v11 = vadd.f32 1e-05, %v638_v10 }
 0xc61   :  { %v637_v12 = vpop.xlane.xlu1 %636 }
 0xc62   :  { %1148 = vrsqrt.f32 %v640_v11  ;;  %v639_v15 = vmul.f32 0.125, %v637_v12 }
 0xc64   :  { %v641_v17 = vadd.f32 1e-05, %v639_v15 }
 0xc66   :  { %1150 = vrsqrt.f32 %v641_v17 }
 0xc6c   :  { %v1149_v18 = vpop.eup %1148 }
 0xc6d   :  { %v644_v19 = vmul.f32 %v1149_v18, %v618_v5 }
 0xc6f   :  { %648 = vperm.xlu1 %1129, %v644_v19  }
 0xc70   :  { %v1151_v20 = vpop.eup %1150 }
 0xc71   :  { %v645_v21 = vmul.f32 %v1151_v20, %v619_v8 }
 0xc73   :  { %653 = vperm.xlu1 %1129, %v645_v21  }
 0xcee   :  { %v649_v22 = vpop.permute.xlu1 %648 }
 0xcef   :  { %v656_v23 = vmul.f32 %v649_v22, %v618_v5 }
 0xcf1   :  { %668 = vxpose.xlu1.b32.start [1/2] (short) (narrow) %v656_v23, 16 }
 0xcf2   :  { %v654_v24 = vpop.permute.xlu1 %653 }
 0xcf3   :  { %v657_v25 = vmul.f32 %v654_v24, %v619_v8 }
 0xcf5   :  { %669 = vxpose.xlu1.b32.end [2/2] (short) (narrow) %v657_v25, 16 }
 0xd71   :  { %v684_v14 = vpop.trf.xlu1 }
 0xd72   :  { %1066 = vmatprep.mubr.msk.f32.mxu1 %vm183_vm5, %v684_v14  ;;  %v947_v14 = vld [vmem:[#allocation5 + $0x60] sm:$0x1f] }
 0xd75   :  { %v685_v26 = vpop.trf.xlu1 }
 0xd76   :  { %1067 = vmatmul.mubr.msk.f32.vlgmr.msra.gmra.mrb[2].mxu1 %vm183_vm5, %v685_v26 }
 0xe49   :  { %v1068_v29 = vpop.f32.mrb[2].mxu1 }
 0xe4a   :  { %v781_v30 = vadd.f32 %v1068_v29, %v666_v28  ;;  %v775_v31 = vpop.f32.mrb[3].mxu1  ;;  %v948_v28 = vld [vmem:[#allocation5 + $0x60] sm:$0x1] }
 0xe4b   :  { %v776_v32 = vadd.f32 %v775_v31, %v661_v27 }
 0xe4c   :  { %v785_v33 = vmul.f32 0.01, %v781_v30 }
 0xe4d   :  { %v784_v34 = vmul.f32 0.01, %v776_v32 }
 0xe4e   :  { %v787_v35 = vmax.f32 %v781_v30, %v785_v33 }
 0xe4f   :  { %v786_v36 = vmax.f32 %v776_v32, %v784_v34 }
 0xe50   :  { %v789_v37 = vmul.f32 %v1290_v7, %v787_v35 }
 0xe51   :  { %v788_v38 = vmul.f32 %v1290_v7, %v786_v36 }
 0xe52   :  { %v795_v39 = vsel %vm104_vm2, %v789_v37, 0.0 }
 0xe53   :  { %796 = vadd.xlane.f32.xlu0 %v795_v39  ;;  %793 = vadd.xlane.f32.xlu1 %v788_v38 }
 0xee0   :  { %v797_v41 = vpop.xlane.xlu0 %796  ;;  %v794_v42 = vpop.xlane.xlu1 %793 }
 0xee1   :  { %v799_v43 = vmul.f32 0.125, %v797_v41  ;;  %v798_v44 = vmul.f32 0.125, %v794_v42 }
 0xee3   :  { %v801_v45 = vsub.f32 %v789_v37, %v799_v43  ;;  %v800_v46 = vsub.f32 %v788_v38, %v798_v44 }
 0xee5   :  { %v803_v47 = vmul.f32 %v1290_v7, %v801_v45  ;;  %v802_v48 = vmul.f32 %v1290_v7, %v800_v46 }
 0xee7   :  { %v1101_v49 = vpack.c.bf16 %v803_v47, %v802_v48  ;;  %v804_v50 = vmul.f32 %v802_v48, %v802_v48  ;;  %v805_v51 = vmul.f32 %v803_v47, %v803_v47 }
 0xee9   :  { %1103 = vmatpush3.bf16.msk.msra.mxu0 %vm1305_vm4, %v1101_v49  ;;  %806 = vadd.xlane.f32.xlu0 %v804_v50  ;;  %v808_v53 = vsel %vm104_vm2, %v805_v51, 0.0 }
 0xeed   :  { %809 = vadd.xlane.f32.xlu0 %v808_v53 }
 0xf76   :  { %v807_v54 = vpop.xlane.xlu0 %806 }
 0xf77   :  { %v811_v55 = vmul.f32 0.125, %v807_v54 }
 0xf79   :  { %v813_v56 = vadd.f32 1e-05, %v811_v55 }
 0xf7a   :  { %v810_v57 = vpop.xlane.xlu0 %809 }
 0xf7b   :  { %1152 = vrsqrt.f32 %v813_v56  ;;  %v812_v58 = vmul.f32 0.125, %v810_v57 }
 0xf7d   :  { %v814_v59 = vadd.f32 1e-05, %v812_v58 }
 0xf7f   :  { %1154 = vrsqrt.f32 %v814_v59 }
 0xf85   :  { %v1153_v61 = vpop.eup %1152 }
 0xf86   :  { %v817_v62 = vmul.f32 %v1153_v61, %v790_v60 }
 0xf88   :  { %821 = vperm.xlu1 %1129, %v817_v62  }
 0xf89   :  { %v1155_v0 = vpop.eup %1154 }
 0xf8a   :  { %v818_v52 = vmul.f32 %v1155_v0, %v791_v63 }
 0xf8c   :  { %826 = vperm.xlu0 %1131, %v818_v52  }
 0xf90   :  { %1132 = vset.pattern.permute.xlu0 %v1237_v16 }
 0xf91   :  { %833 = vperm.xlu0 %1132, %v792_v4  }
0x1007   :  { %v822_v1 = vpop.permute.xlu1 %821 }
0x1008   :  { %v829_v2 = vmul.f32 %v822_v1, %v790_v60 }
0x100a   :  { %836 = vxpose.xlu1.b32.start [1/2] (short) (narrow) %v829_v2, 8 }
0x100b   :  { %v827_v3 = vpop.permute.xlu0 %826 }
0x100c   :  { %v830_v5 = vmul.f32 %v827_v3, %v791_v63 }
0x100e   :  { %837 = vxpose.xlu1.b32.end [2/2] (short) (narrow) %v830_v5, 8 }
0x1010   :  { %v834_v9 = vpop.permute.xlu0 %833 }
0x102c   :  { %1133 = vset.pattern.permute.xlu1 %v1235_v13 }
0x108a   :  { %v852_v8 = vpop.trf.xlu1 }
0x108b   :  { %1074 = vmatmul.mubr.msk.f32.vlgmr.msra.gmra.mrb[4].mxu0 %vm183_vm5, %v852_v8 }
0x115e   :  { %v940_v10 = vpop.f32.mrb[4].mxu0 }
0x115f   :  { %v941_v11 = vadd.f32 %v940_v10, %v834_v9  ;;  %v1075_v12 = vpop.f32.mrb[5].mxu0 }
0x1161   :  { %v944_v6 = vmul.f32 0.01, %v941_v11 }
0x1163   :  { %v945_v15 = vmax.f32 %v941_v11, %v944_v6 }
0x1165   :  { %v946_v16 = vmul.f32 %v1290_v7, %v945_v15 }
0x1167   :  { %v950_v17 = vsel %vm949_vm7, %v946_v16, 0.0 }
0x1168   :  { %951 = vadd.xlane.f32.xlu0 %v950_v17 }
0x11f5   :  { %v952_v18 = vpop.xlane.xlu0 %951 }
0x11f6   :  { %v953_v19 = vmul.f32 0.125, %v952_v18 }
0x11f8   :  { %v954_v20 = vsub.f32 %v946_v16, %v953_v19 }
0x11fa   :  { %v955_v13 = vmul.f32 %v1290_v7, %v954_v20 }
0x11fc   :  { %v956_v21 = vmul.f32 %v955_v13, %v955_v13 }
0x11fe   :  { %v957_v22 = vsel %vm949_vm7, %v956_v21, 0.0 }
0x11ff   :  { %958 = vadd.xlane.f32.xlu1 %v957_v22 }
0x128c   :  { %v959_v23 = vpop.xlane.xlu1 %958 }
0x128d   :  { %v960_v24 = vmul.f32 0.125, %v959_v23 }
0x128f   :  { %v961_v25 = vadd.f32 1e-05, %v960_v24 }
0x1291   :  { %1156 = vrsqrt.f32 %v961_v25 }
0x129b   :  { %v1157_v26 = vpop.eup %1156 }
0x129c   :  { %v963_v27 = vmul.f32 %v1157_v26, %v947_v14 }
0x129e   :  { %965 = vrot.lane.b32.xlu0 %v963_v27, %s1241_s1 }
0x12a2   :  { %984 = vperm.xlu0 %1132, %v948_v28  }
0x1310   :  { %v966_v29 = vpop.permute.xlu0 %965 }
0x1311   :  { %v968_v30 = vmul.f32 %v966_v29, %v947_v14 }
0x1313   :  { %971 = vperm.xlu1 %1133, %v968_v30  }
0x1321   :  { %v985_v39 = vpop.permute.xlu0 %984 }
0x1392   :  { %v972_v31 = vpop.permute.xlu1 %971 }
0x1393   :  { %v974_v7 = vmul.f32 %v972_v31, %v955_v13 }
0x1395   :  { %v975_v32 = vsel %vm949_vm7, %v974_v7, 0.0 }
0x1396   :  { %v976_v33 = vrot.slane %v975_v32, 4 }
0x1398   :  { %v977_v34 = vadd.f32 %v976_v33, %v975_v32 }
0x139a   :  { %v978_v35 = vrot.slane %v977_v34, 2 }
0x139c   :  { %v979_v36 = vadd.f32 %v978_v35, %v977_v34 }
0x139e   :  { %v980_v37 = vrot.slane %v979_v36, 1 }
0x13a0   :  { %v981_v38 = vadd.f32 %v980_v37, %v979_v36 }
0x13a2   :  { %v987_v40 = vadd.f32 %v985_v39, %v981_v38 }
0x13a4   :  { %v988_v41 = vmul.f32 0.01, %v987_v40 }
0x13a6   :  { %v989_v42 = vmax.f32 %v987_v40, %v988_v41 }
0x13a8   :  { %990 = vst [vmem:[#allocation7] sm:$0x1] %v989_v42 }
0x13a9   :  { %1213 = shalt.err (!%p1210_p6)
}
0x13aa   :  { %s1214_s13 = scalar_lea.hbm %s1392_s2, 16 }
0x13ab   :  { %p1215_p7 = scmp.ne.s32.totalorder %s1392_s2, %s1214_s13  ;;  %p1218_p8 = scmp.lt.u32.totalorder %s1214_s13, %s1392_s2 }
0x13ad   :  { %p1220_p9 = pnand %p1218_p8, %p1215_p7 }
0x13af   :  { %1223 = shalt.err (!%p1220_p9)
}
0x13b0   :  { %1000 = dma.vmem_to_hbm [thread:$0]  %s998_s8, 16, %s1392_s2, [#allocation4]  }
0x13b1   :  { %1228 = dma.done.wait [#allocation4], 16  }
0x13b2   :  { %1229 = vsyncadd [#allocation4], 4294967280 }
0x13b3   :  { %1004 = vsyncpa [#allocation3], 1 }
0x13b4   :  { %1005 = vsyncpa [#allocation6], 1 }
0x13b5   :  { %1006 = vsyncpa [#allocation4], 1 }

</bundles_post_ra>
